<compile_context>
chip_gen: v6e
topology: v6e:2x2x1
jax: 0.10.0
libtpu: 0.0.40
codegen_flags: <defaults>
</compile_context>

<pallas_src>
import math
import functools

import jax
import jax.numpy as jnp
from jax.experimental import pallas as pl
from jax.experimental.pallas import tpu as pltpu


def _round_up(x, m):
    return (x + m - 1) // m * m


def time_embedding_kernel(t_ref, freq_ref, phase_ref, w_ref, b_ref, o_ref):
    """One batch tile: relu(sin(t*freq + phase) @ W + b).

    t_ref:     (TB, 1)   f32 timesteps for this tile
    freq_ref:  (1, Kp)   f32 packed frequencies [f, f, 0...] (sin rows then cos rows)
    phase_ref: (1, Kp)   f32 phases             [0, pi/2, 0...]  (sin(x+pi/2)=cos(x))
    w_ref:     (Kp, Dp)  packed weight slab (sin rows stacked above cos rows)
    b_ref:     (1, Dp)   f32 bias, zero-padded
    o_ref:     (TB, Dp)  output (f32 or bf16)
    """
    ang = t_ref[...] * freq_ref[...] + phase_ref[...]       # (TB, Kp) VPU outer product
    emb = jnp.sin(ang).astype(w_ref.dtype)                  # single EUP pass (sin & cos)
    # Padded lanes have freq=0, phase=0 -> sin(0)=0, and their weight rows are zero,
    # so they contribute nothing to the dot.
    y = jnp.dot(emb, w_ref[...], preferred_element_type=jnp.float32)
    y = y + b_ref[...]
    o_ref[...] = jnp.maximum(y, 0.0).astype(o_ref.dtype)    # ReLU; dropout = identity (eval)
    # TODO(synk): training-mode dropout via pltpu.prng_seed/prng_random_bits + mask.


def prepare_time_embedding_params(w, b, *, embed_dim, mxu_dtype=jnp.bfloat16):
    """Once-per-model preprocessing (hoisted out of the per-step call path).

    w: (D, D) PyTorch nn.Linear weight layout (out, in);  b: (D,).
    Returns (freqs_p, phase_p, w_p, b_p) padded to lane-dense shapes.
    """
    assert embed_dim >= 4, "sinusoidal embedding needs half_dim >= 2"
    half = embed_dim // 2
    Kp = _round_up(2 * half, 128)    # packed sin+cos K dimension, lane-dense
    Dp = _round_up(embed_dim, 128)   # lane-dense output dimension

    emb_constant = math.log(10000.0) / (half - 1)
    freqs = jnp.exp(jnp.arange(half, dtype=jnp.float32) * -emb_constant)

    # Packed frequency table: sin rows [0:half], cos rows [half:2*half], zeros after.
    freqs_p = (jnp.zeros((1, Kp), jnp.float32)
               .at[0, :half].set(freqs)
               .at[0, half:2 * half].set(freqs))
    # Phase pi/2 on the cos rows: sin(x + pi/2) == cos(x).
    phase_p = jnp.zeros((1, Kp), jnp.float32).at[0, half:2 * half].set(0.5 * math.pi)

    wt = jnp.asarray(w, jnp.float32).T               # (D_in, D_out)
    # Input rows [:half] multiply sin, [half:2*half] multiply cos.  For odd embed_dim
    # the last input row corresponds to the zero pad column of the sinusoidal
    # embedding and can be dropped (identical result).
    w_p = jnp.zeros((Kp, Dp), jnp.float32).at[:2 * half, :embed_dim].set(wt[:2 * half])
    b_p = jnp.zeros((1, Dp), jnp.float32).at[0, :embed_dim].set(
        jnp.asarray(b, jnp.float32))
    return freqs_p, phase_p, w_p.astype(mxu_dtype), b_p


@functools.partial(jax.jit,
                   static_argnames=("embed_dim", "block_b", "out_dtype",
                                    "return_padded"))
def time_embedding(t, freqs_p, phase_p, w_p, b_p, *, embed_dim, block_b=512,
                   out_dtype=jnp.float32, return_padded=False):
    """t: (B,) timesteps.  Returns (B, embed_dim) = dropout(relu(linear(sin_emb)))."""
    B = t.shape[0]
    Kp = freqs_p.shape[1]
    Dp = w_p.shape[1]

    # Balanced batch tiling: minimal padding (< 8 rows) and >= 2 grid points for big
    # batches so the "parallel" axis feeds both TensorCores on v7x.
    block_b = _round_up(max(block_b, 8), 8)
    n_tiles = max(pl.cdiv(B, block_b), 2 if B >= 64 else 1)
    TB = _round_up(pl.cdiv(B, n_tiles), 8)
    B_p = _round_up(B, TB)

    t32 = t.astype(jnp.float32).reshape(B, 1)
    t2 = t32 if B_p == B else jnp.pad(t32, ((0, B_p - B), (0, 0)))

    # Grid-invariant operands: single-buffer them when the weight slab is large
    # (saves VMEM on v7x's 64 MiB); small slabs keep the default (validated) path.
    w_itemsize = jnp.dtype(w_p.dtype).itemsize
    weight_bytes = Kp * Dp * w_itemsize
    big_consts = weight_bytes > (2 << 20)
    const_kw = {"pipeline_mode": pl.Buffered(1)} if big_consts else {}

    out_itemsize = jnp.dtype(out_dtype).itemsize
    const_bufs = 1 if big_consts else 2
    footprint = (2 * TB * (4 + Dp * out_itemsize)                   # t + out, double-buffered
                 + const_bufs * (2 * Kp * 4 + weight_bytes + Dp * 4))
    cp_kwargs = dict(dimension_semantics=("parallel",))
    if footprint > (28 << 20):
        cp_kwargs["vmem_limit_bytes"] = min(100 << 20, int(footprint * 5 // 4))

    out = pl.pallas_call(
        time_embedding_kernel,
        out_shape=jax.ShapeDtypeStruct((B_p, Dp), out_dtype),
        grid=(B_p // TB,),
        in_specs=[
            pl.BlockSpec((TB, 1), lambda i: (i, 0)),                 # pipelined t tile
            pl.BlockSpec((1, Kp), lambda i: (0, 0), **const_kw),     # VMEM-resident consts
            pl.BlockSpec((1, Kp), lambda i: (0, 0), **const_kw),
            pl.BlockSpec((Kp, Dp), lambda i: (0, 0), **const_kw),
            pl.BlockSpec((1, Dp), lambda i: (0, 0), **const_kw),
        ],
        out_specs=pl.BlockSpec((TB, Dp), lambda i: (i, 0)),
        compiler_params=pltpu.CompilerParams(**cp_kwargs),
    )(t2, freqs_p, phase_p, w_p, b_p)

    if return_padded:
        return out            # (B_p, Dp); lane-padding-aware consumers skip the copy
    if B_p == B and Dp == embed_dim:
        return out
    if Dp == embed_dim:
        return out[:B]
    return out[:B, :embed_dim]


def time_embedding_ref(t, w, b, embed_dim):
    """Pure-JAX reference mirroring the PyTorch forward (eval mode)."""
    half = embed_dim // 2
    emb_constant = math.log(10000.0) / (half - 1)
    freqs = jnp.exp(jnp.arange(half, dtype=jnp.float32) * -emb_constant)
    emb = t.astype(jnp.float32)[:, None] * freqs[None, :]
    emb = jnp.concatenate([jnp.sin(emb), jnp.cos(emb)], axis=1)
    if embed_dim % 2:
        emb = jnp.pad(emb, ((0, 0), (0, 1)))
    y = emb @ w.T + b
    return jnp.maximum(y, 0.0)


if __name__ == "__main__":
    embed_dim = 32
    batch = 8

    key = jax.random.PRNGKey(0)
    k_w, k_b, k_t = jax.random.split(key, 3)

    # Deterministic synthetic parameters (PyTorch nn.Linear layout: (out, in)).
    bound = 1.0 / math.sqrt(embed_dim)
    w = jax.random.uniform(k_w, (embed_dim, embed_dim), jnp.float32, -bound, bound)
    b = jax.random.uniform(k_b, (embed_dim,), jnp.float32, -bound, bound)

    # Timesteps (like diffusion step indices).
    t = jax.random.randint(k_t, (batch,), 0, 1000).astype(jnp.float32)
    ref = time_embedding_ref(t, w, b, embed_dim)

    # f32 MXU path.  Tolerance accounts for the sin(x+pi/2)==cos(x) phase trick:
    # adding pi/2 to angles of magnitude ~1e3 in f32 perturbs them by ~3e-5.
    params_f32 = prepare_time_embedding_params(w, b, embed_dim=embed_dim,
                                               mxu_dtype=jnp.float32)
    out_f32 = jax.block_until_ready(
        time_embedding(t, *params_f32, embed_dim=embed_dim))
    assert out_f32.shape == (batch, embed_dim)
    assert jnp.allclose(out_f32, ref, atol=1e-3, rtol=1e-3), "f32 mismatch vs reference"

    # bf16 MXU path (recommended on v6e/v7x): f32 accumulation, looser tolerance.
    params_bf16 = prepare_time_embedding_params(w, b, embed_dim=embed_dim,
                                                mxu_dtype=jnp.bfloat16)
    out_bf16 = jax.block_until_ready(
        time_embedding(t, *params_bf16, embed_dim=embed_dim))
    assert out_bf16.shape == (batch, embed_dim)
    assert jnp.allclose(out_bf16, ref, atol=5e-2, rtol=5e-2), "bf16 mismatch vs reference"

    # Larger batch exercises the multi-tile (grid >= 2) parallel path.
    t_big = jax.random.randint(jax.random.PRNGKey(7), (96,), 0, 1000).astype(jnp.float32)
    ref_big = time_embedding_ref(t_big, w, b, embed_dim)
    out_big = jax.block_until_ready(
        time_embedding(t_big, *params_f32, embed_dim=embed_dim))
    assert out_big.shape == (96, embed_dim)
    assert jnp.allclose(out_big, ref_big, atol=1e-3, rtol=1e-3), "multi-tile mismatch"

    print("KERNEL_OK")
</pallas_src>

<mosaic_0001>
module attributes {stable_mosaic.version = 11 : i64} {
  func.func @time_embedding_kernel(%arg0: i32, %arg1: memref<8x1xf32, #tpu.memory_space<vmem>>, %arg2: memref<1x128xf32, #tpu.memory_space<vmem>>, %arg3: memref<1x128xf32, #tpu.memory_space<vmem>>, %arg4: memref<128x128xf32, #tpu.memory_space<vmem>>, %arg5: memref<1x128xf32, #tpu.memory_space<vmem>>, %arg6: memref<8x128xf32, #tpu.memory_space<vmem>>) attributes {dimension_semantics = [#tpu.dimension_semantics<parallel>], iteration_bounds = array<i64: 1>, scalar_prefetch = 0 : i64, scratch_operands = 0 : i64, tpu.core_type = #tpu.core_type<tc>, window_params = [{transform_indices = @transform_0, window_bounds = array<i64: 8, 1>}, {pipeline_mode = #tpu.pipeline_mode<synchronous>, transform_indices = @transform_1, window_bounds = array<i64: 1, 128>}, {pipeline_mode = #tpu.pipeline_mode<synchronous>, transform_indices = @transform_2, window_bounds = array<i64: 1, 128>}, {pipeline_mode = #tpu.pipeline_mode<synchronous>, transform_indices = @transform_3, window_bounds = array<i64: 128, 128>}, {pipeline_mode = #tpu.pipeline_mode<synchronous>, transform_indices = @transform_4, window_bounds = array<i64: 1, 128>}, {transform_indices = @transform_5, window_bounds = array<i64: 8, 128>}]} {
    %c0 = arith.constant 0 : index
    %c0_0 = arith.constant 0 : index
    %0 = vector.load %arg1[%c0, %c0_0] : memref<8x1xf32, #tpu.memory_space<vmem>>, vector<8x1xf32>
    %c0_1 = arith.constant 0 : index
    %c0_2 = arith.constant 0 : index
    %1 = vector.load %arg2[%c0_1, %c0_2] : memref<1x128xf32, #tpu.memory_space<vmem>>, vector<1x128xf32>
    %2 = vector.broadcast %0 : vector<8x1xf32> to vector<8x128xf32>
    %3 = vector.broadcast %1 : vector<1x128xf32> to vector<8x128xf32>
    %4 = arith.mulf %2, %3 : vector<8x128xf32>
    %c0_3 = arith.constant 0 : index
    %c0_4 = arith.constant 0 : index
    %5 = vector.load %arg3[%c0_3, %c0_4] : memref<1x128xf32, #tpu.memory_space<vmem>>, vector<1x128xf32>
    %6 = vector.broadcast %5 : vector<1x128xf32> to vector<8x128xf32>
    %7 = arith.addf %4, %6 : vector<8x128xf32>
    %8 = math.sin %7 : vector<8x128xf32>
    %c0_5 = arith.constant 0 : index
    %c0_6 = arith.constant 0 : index
    %9 = vector.load %arg4[%c0_5, %c0_6] : memref<128x128xf32, #tpu.memory_space<vmem>>, vector<128x128xf32>
    %cst = arith.constant dense<0.000000e+00> : vector<8x128xf32>
    %10 = tpu.matmul %8, %9, %cst {dimension_numbers = #tpu.dot_dimension_numbers<[1], [0], [0], [1], [0, 0, 1, 1], [], []>} : vector<8x128xf32>, vector<128x128xf32>, vector<8x128xf32> -> vector<8x128xf32>
    %c0_7 = arith.constant 0 : index
    %c0_8 = arith.constant 0 : index
    %11 = vector.load %arg5[%c0_7, %c0_8] : memref<1x128xf32, #tpu.memory_space<vmem>>, vector<1x128xf32>
    %12 = vector.broadcast %11 : vector<1x128xf32> to vector<8x128xf32>
    %13 = arith.addf %10, %12 : vector<8x128xf32>
    %cst_9 = arith.constant 0.000000e+00 : f32
    %14 = vector.broadcast %cst_9 : f32 to vector<8x128xf32>
    %15 = arith.maximumf %13, %14 : vector<8x128xf32>
    %c0_10 = arith.constant 0 : index
    %c0_11 = arith.constant 0 : index
    %16 = vector.load %arg6[%c0_10, %c0_11] : memref<8x128xf32, #tpu.memory_space<vmem>>, vector<8x128xf32>
    tpu.vector_store %arg6[%c0_10, %c0_11], %15 {strides = array<i32>} : memref<8x128xf32, #tpu.memory_space<vmem>>, vector<8x128xf32>,
    return
  }
  func.func @transform_0(%arg0: i32) -> (i32, i32) {
    %c0_i32 = arith.constant 0 : i32
    %c0_i32_0 = arith.constant 0 : i32
    return %arg0, %c0_i32 : i32, i32
  }
  func.func @transform_1(%arg0: i32) -> (i32, i32) {
    %c0_i32 = arith.constant 0 : i32
    %c0_i32_0 = arith.constant 0 : i32
    %c0_i32_1 = arith.constant 0 : i32
    return %c0_i32, %c0_i32_0 : i32, i32
  }
  func.func @transform_2(%arg0: i32) -> (i32, i32) {
    %c0_i32 = arith.constant 0 : i32
    %c0_i32_0 = arith.constant 0 : i32
    %c0_i32_1 = arith.constant 0 : i32
    return %c0_i32, %c0_i32_0 : i32, i32
  }
  func.func @transform_3(%arg0: i32) -> (i32, i32) {
    %c0_i32 = arith.constant 0 : i32
    %c0_i32_0 = arith.constant 0 : i32
    %c0_i32_1 = arith.constant 0 : i32
    return %c0_i32, %c0_i32_0 : i32, i32
  }
  func.func @transform_4(%arg0: i32) -> (i32, i32) {
    %c0_i32 = arith.constant 0 : i32
    %c0_i32_0 = arith.constant 0 : i32
    %c0_i32_1 = arith.constant 0 : i32
    return %c0_i32, %c0_i32_0 : i32, i32
  }
  func.func @transform_5(%arg0: i32) -> (i32, i32) {
    %c0_i32 = arith.constant 0 : i32
    %c0_i32_0 = arith.constant 0 : i32
    return %arg0, %c0_i32 : i32, i32
  }
}

</mosaic_0001>

<bundles_post_ra>
// kernel: time_embedding.1
= control target key start
LH: loop header
LB: loop body
LE: loop exit
PB: predicated region body
PF: predicated region fallthrough
CT: control target
= control target key end

     0   :  { %10 = vsyncpa [#allocation3], 0  ;;  %s478_s0 = inlined_call_operand.vmem [shape: f32[8,1], index: 0, kind: input, shape index: {}]   ;;  %s479_s1 = inlined_call_operand.vmem [shape: f32[1,128], index: 1, kind: input, shape index: {}]   ;;  %s480_s2 = inlined_call_operand.vmem [shape: f32[1,128], index: 2, kind: input, shape index: {}]   ;;  %s481_s3 = inlined_call_operand.hbm [shape: f32[128,128], index: 3, kind: input, shape index: {}]   ;;  %s482_s4 = inlined_call_operand.vmem [shape: f32[1,128], index: 4, kind: input, shape index: {}]   ;;  %s483_s5 = inlined_call_operand.hbm [shape: f32[8,128], index: 5, kind: output, shape index: {}]  }
   0x1   :  { %11 = vsyncpa [#allocation4], 0  ;;  %s396_s18 = smov [#allocation2]  }
   0x2   :  { %s23_s19 = sshll.u32 %s396_s18, 4  ;;  %s24_s19 = int_to_ptr.vmem [resolvable:$true] %s23_s19 }
   0x3   :  { %s360_s20 = scalar_lea.vmem %s24_s19, 2048  ;;  %p365_p1 = scmp.lt.s32.totalorder %s24_s19, %s24_s19 }
   0x4   :  { %p361_p0 = scmp.ne.s32.totalorder %s24_s19, %s360_s20  ;;  %p366_p2 = scmp.lt.s32.totalorder %s360_s20, %s360_s20 }
   0x6   :  { %p367_p3 = por %p366_p2, %p365_p1 }
   0x8   :  { %p368_p4 = pnand %p367_p3, %p361_p0 }
   0xa   :  { %371 = shalt.err (!%p368_p4)
}
   0xb   :  { %s397_s21 = smov 128   ;;  %s398_s22 = smov 8  }
   0xc   :  { %29 = dma.hbm_to_vmem [thread:$0]  %s481_s3, 2048, %s24_s19, [#allocation3], %s397_s21, %s397_s21, %s398_s22  }
   0xd   :  { %392 = dma.done.wait [#allocation3], 2048  }
   0xe   :  { %393 = vsyncadd [#allocation3], 4294965248  ;;  %v399_v0 = vmov 0   ;;  %v35_v1 = vld [vmem:[%s478_s0] sm:$0xff]  ;;  %v176_v2 = vld [vmem:[#allocation2 + $0x78] sm:$0xff]  ;;  %v400_v3 = vmov 0.0  }
   0xf   :  { %347 = vset.pattern.permute.xlu0 %v399_v0  ;;  %295 = vmatprep.subr.mxu0 %v400_v3  ;;  %v175_v4 = vld [vmem:[#allocation2 + $0x70] sm:$0xff]  ;;  %vm401_vm0 = vmmov 0   ;;  %v174_v5 = vld [vmem:[#allocation2 + $0x68] sm:$0xff]  ;;  %v173_v6 = vld [vmem:[#allocation2 + $0x60] sm:$0xff]  ;;  %v402_v35 = vmov 2102212464  }
  0x10   :  { %39 = vperm.xlu0 %347, %v35_v1   ;;  %327 = vmatprep.mubr.msk.f32.mxu0 %vm401_vm0, %v400_v3  ;;  %v172_v7 = vld [vmem:[#allocation2 + $0x58] sm:$0xff]  ;;  %v171_v8 = vld [vmem:[#allocation2 + $0x50] sm:$0xff]  ;;  %v170_v9 = vld [vmem:[#allocation2 + $0x48] sm:$0xff]  ;;  %v403_v37 = vmov 920167782   ;;  %s408_s29 = smov [#allocation5]  }
  0x11   :  { %296 = vmatpush3.msra.mxu0 %v176_v2  ;;  %v169_v10 = vld [vmem:[#allocation2 + $0x40] sm:$0xff]  ;;  %v168_v11 = vld [vmem:[#allocation2 + $0x38] sm:$0xff]  ;;  %v167_v12 = vld [vmem:[#allocation2 + $0x30] sm:$0xff]  ;;  %v404_v41 = vmov 1326507024   ;;  %s262_s30 = sshll.u32 %s408_s29, 4  ;;  %s263_s30 = int_to_ptr.vmem [resolvable:$true] %s262_s30 }
  0x12   :  { %297 = vmatprep.subr.mxu0 %v400_v3  ;;  %v166_v13 = vld [vmem:[#allocation2 + $0x28] sm:$0xff]  ;;  %v165_v14 = vld [vmem:[#allocation2 + $0x20] sm:$0xff]  ;;  %v164_v15 = vld [vmem:[#allocation2 + $0x18] sm:$0xff]  ;;  %v405_v43 = vmov 683565275   ;;  %s372_s6 = scalar_lea.vmem %s263_s30, 128  ;;  %p377_p6 = scmp.lt.s32.totalorder %s263_s30, %s263_s30 }
  0x13   :  { %298 = vmatpush3.msra.mxu0 %v175_v4  ;;  %v163_v16 = vld [vmem:[#allocation2 + $0x10] sm:$0xff]  ;;  %v162_v17 = vld [vmem:[#allocation2 + $0x8] sm:$0xff]  ;;  %v161_v18 = vld [vmem:[#allocation2] sm:$0xff]  ;;  %v406_v45 = vmov 2475754826   ;;  %p373_p5 = scmp.ne.s32.totalorder %s263_s30, %s372_s6  ;;  %p378_p7 = scmp.lt.s32.totalorder %s372_s6, %s372_s6 }
  0x14   :  { %299 = vmatprep.subr.mxu0 %v400_v3  ;;  %v271_v19 = vld [vmem:[%s479_s1] ss:$0 sm:$0xff]  ;;  %v407_v48 = vmov 2131351028  }
  0x15   :  { %300 = vmatpush3.msra.mxu0 %v174_v5  ;;  %v272_v20 = vld [vmem:[%s480_s2] ss:$0 sm:$0xff]  ;;  %p379_p8 = por %p378_p7, %p377_p6 }
  0x16   :  { %301 = vmatprep.subr.mxu0 %v400_v3 }
  0x17   :  { %302 = vmatpush3.msra.mxu0 %v173_v6  ;;  %p380_p9 = pnand %p379_p8, %p373_p5 }
  0x18   :  { %303 = vmatprep.subr.mxu0 %v400_v3 }
  0x19   :  { %304 = vmatpush3.msra.mxu0 %v172_v7 }
  0x1a   :  { %305 = vmatprep.subr.mxu0 %v400_v3 }
  0x1b   :  { %306 = vmatpush3.msra.mxu0 %v171_v8 }
  0x1c   :  { %307 = vmatprep.subr.mxu0 %v400_v3 }
  0x1d   :  { %308 = vmatpush3.msra.mxu0 %v170_v9 }
  0x1e   :  { %309 = vmatprep.subr.mxu0 %v400_v3 }
  0x1f   :  { %310 = vmatpush3.msra.mxu0 %v169_v10 }
  0x20   :  { %311 = vmatprep.subr.mxu0 %v400_v3 }
  0x21   :  { %312 = vmatpush3.msra.mxu0 %v168_v11 }
  0x22   :  { %313 = vmatprep.subr.mxu0 %v400_v3 }
  0x23   :  { %314 = vmatpush3.msra.mxu0 %v167_v12 }
  0x24   :  { %315 = vmatprep.subr.mxu0 %v400_v3 }
  0x25   :  { %316 = vmatpush3.msra.mxu0 %v166_v13 }
  0x26   :  { %317 = vmatprep.subr.mxu0 %v400_v3 }
  0x27   :  { %318 = vmatpush3.msra.mxu0 %v165_v14 }
  0x28   :  { %319 = vmatprep.subr.mxu0 %v400_v3 }
  0x29   :  { %320 = vmatpush3.msra.mxu0 %v164_v15 }
  0x2a   :  { %321 = vmatprep.subr.mxu0 %v400_v3 }
  0x2b   :  { %322 = vmatpush3.msra.mxu0 %v163_v16 }
  0x2c   :  { %323 = vmatprep.subr.mxu0 %v400_v3 }
  0x2d   :  { %324 = vmatpush3.msra.mxu0 %v162_v17 }
  0x2e   :  { %325 = vmatprep.subr.mxu0 %v400_v3 }
  0x2f   :  { %326 = vmatpush3.msra.mxu0 %v161_v18 }
  0x8b   :  { %v40_v21 = vpop.permute.xlu0 %39 }
  0x8c   :  { %v48_v22 = vmul.f32 %v271_v19, %v40_v21 }
  0x8e   :  { %v451_v23 = vadd.f32 %v272_v20, %v48_v22 }
  0x90   :  { %v60_v24 = vand.u32 2139095040, %v451_v23  ;;  %v57_v25 = vand.u32 2147483647, %v451_v23  ;;  %vm59_vm8 = vcmp.lt.s32.totalorder %v451_v23, 0  ;;  %vm149_vm13 = vweird.f32 %v451_v23 }
  0x92   :  { %v61_v26 = vshrl.u32 %v60_v24, 23  ;;  %v64_v28 = vand.u32 8388607, %v57_v25  ;;  %vm58_vm9 = vcmp.le.f32.partialorder %v57_v25, 0.7853982 }
  0x94   :  { %v273_v27 = vadd.s32 4294967169, %v61_v26  ;;  %v65_v31 = vor.u32 8388608, %v64_v28 }
  0x96   :  { %v67_v29 = vadd.s32 1, %v273_v27  ;;  %v105_v39 = vshll.u32 %v65_v31, 8 }
  0x98   :  { %vm68_vm1 = vcmp.gt.s32.totalorder %v67_v29, 0 }
  0x99   :  { %v69_v30 = vsel %vm68_vm1, %v67_v29, 0 }
  0x9a   :  { %v71_v32 = vand.u32 31, %v69_v30  ;;  %v70_v33 = vshrl.u32 %v69_v30, 5 }
  0x9c   :  { %v72_v34 = vsub.s32 32, %v71_v32  ;;  %v83_v36 = vshll.u32 %v402_v35, %v71_v32  ;;  %v86_v38 = vshll.u32 %v403_v37, %v71_v32  ;;  %v74_v44 = vshll.u32 %v405_v43, %v71_v32 }
  0x9d   :  { %v77_v47 = vshll.u32 %v406_v45, %v71_v32  ;;  %v80_v50 = vshll.u32 %v407_v48, %v71_v32  ;;  %vm92_vm2 = vcmp.lt.s32.totalorder %v70_v33, 4  ;;  %vm89_vm3 = vcmp.lt.s32.totalorder %v70_v33, 1 }
  0x9e   :  { %v84_v40 = vshrl.u32 %v403_v37, %v72_v34  ;;  %v87_v42 = vshrl.u32 %v404_v41, %v72_v34  ;;  %v75_v46 = vshrl.u32 %v406_v45, %v72_v34  ;;  %v78_v49 = vshrl.u32 %v407_v48, %v72_v34 }
  0x9f   :  { %v81_v51 = vshrl.u32 %v402_v35, %v72_v34  ;;  %v73_v55 = vshrl.u32 %v405_v43, %v72_v34  ;;  %vm90_vm4 = vcmp.lt.s32.totalorder %v70_v33, 2  ;;  %vm91_vm5 = vcmp.lt.s32.totalorder %v70_v33, 3 }
  0xa0   :  { %v85_v52 = vor.u32 %v84_v40, %v83_v36  ;;  %v88_v53 = vor.u32 %v87_v42, %v86_v38  ;;  %v76_v54 = vor.u32 %v75_v46, %v74_v44  ;;  %v79_v56 = vor.u32 %v78_v49, %v77_v47 }
  0xa1   :  { %v82_v57 = vor.u32 %v81_v51, %v80_v50 }
  0xa2   :  { %v98_v58 = vsel %vm92_vm2, %v85_v52, 920167782  ;;  %v102_v59 = vsel %vm92_vm2, %v88_v53, 1326507024  ;;  %v97_v61 = vsel %vm89_vm3, %v76_v54, %v79_v56  ;;  %v93_v0 = vsel %vm89_vm3, %v73_v55, %v76_v54 }
  0xa3   :  { %v94_v60 = vsel %vm92_vm2, %v82_v57, 2102212464  ;;  %v99_v62 = vsel %vm91_vm5, %v82_v57, %v98_v58  ;;  %v101_v63 = vsel %vm89_vm3, %v79_v56, %v82_v57  ;;  %v103_v3 = vsel %vm91_vm5, %v85_v52, %v102_v59  ;;  %v277_v52 = vld [vmem:[%s482_s4] ss:$0 sm:$0xff] }
  0xa4   :  { %v95_v1 = vsel %vm91_vm5, %v79_v56, %v94_v60  ;;  %v100_v2 = vsel %vm90_vm4, %v97_v61, %v99_v62  ;;  %v104_v4 = vsel %vm90_vm4, %v101_v63, %v103_v3 }
  0xa5   :  { %v457_v5 = vmul.u32.u64.low %v105_v39, %v100_v2  ;;  %v458_v6 = vmul.u32.u64.high %v105_v39, %v100_v2, %v457_v5  ;;  %v460_v7 = vmul.u32.u64.low %v105_v39, %v104_v4  ;;  %v461_v8 = vmul.u32.u64.high %v105_v39, %v104_v4, %v460_v7 }
  0xa6   :  { %v96_v9 = vsel %vm90_vm4, %v93_v0, %v95_v1 }
  0xa7   :  { %v115_v10 = vadd.s32 1, %v458_v6  ;;  %v112_v11 = vmul.u32 %v105_v39, %v96_v9  ;;  %vm114_vm6 = vc.u32 %v461_v8, %v457_v5  ;;  %v113_v24 = vadd.s32 %v457_v5, %v461_v8 }
  0xa9   :  { %v116_v12 = vsel %vm114_vm6, %v115_v10, %v458_v6 }
  0xaa   :  { %v117_v13 = vadd.s32 %v116_v12, %v112_v11 }
  0xac   :  { %v118_v14 = vadd.s32 536870912, %v117_v13 }
  0xae   :  { %v119_v15 = vshrl.u32 %v118_v14, 30 }
  0xb0   :  { %v120_v16 = vshll.u32 %v119_v15, 30  ;;  %v143_v38 = vsub.s32 4, %v119_v15 }
  0xb2   :  { %v121_v17 = vsub.s32 %v117_v13, %v120_v16  ;;  %v144_v41 = vsel %vm59_vm8, %v143_v38, %v119_v15 }
  0xb3   :  { %v146_v42 = vsel %vm58_vm9, 0, %v144_v41 }
  0xb4   :  { %v123_v18 = vsub.s32 0, %v121_v17  ;;  %v150_v43 = vadd.s32 3, %v146_v42 }
  0xb6   :  { %v274_v19 = vmin.u32 %v123_v18, %v121_v17  ;;  %v151_v44 = vand.u32 3, %v150_v43 }
  0xb8   :  { %v125_v20 = vclz %v274_v19  ;;  %vm156_vm10 = vcmp.eq.s32.totalorder %v151_v44, 2  ;;  %vm153_vm11 = vcmp.eq.s32.totalorder %v151_v44, 0  ;;  %vm152_vm12 = vcmp.lt.s32.totalorder %v151_v44, 2 }
  0xba   :  { %v275_v21 = vadd.s32 4294967294, %v125_v20 }
  0xbc   :  { %vm276_vm7 = vcmp.lt.s32.totalorder %v275_v21, 0 }
  0xbd   :  { %v128_v22 = vsel %vm276_vm7, 0, %v275_v21 }
  0xbe   :  { %v129_v26 = vsub.s32 32, %v128_v22  ;;  %v133_v27 = vsub.s32 4294967266, %v128_v22  ;;  %v130_v28 = vshll.u32 %v121_v17, %v128_v22 }
  0xc0   :  { %v131_v29 = vshrl.u32 %v113_v24, %v129_v26  ;;  %v134_v30 = vadd.s32 127, %v133_v27 }
  0xc2   :  { %v132_v31 = vor.u32 %v131_v29, %v130_v28  ;;  %v135_v32 = vshll.u32 %v134_v30, 23 }
  0xc4   :  { %v136_v33 = vor.u32 4788187, %v135_v32  ;;  %v139_v35 = vcvt.s32.f32 %v132_v31 }
  0xc6   :  { %v137_v34 = vand.u32 2147483647, %v136_v33 }
  0xc8   :  { %v140_v36 = vmul.f32 %v139_v35, %v137_v34 }
  0xca   :  { %v141_v37 = vxor.u32 2147483648, %v140_v36 }
  0xcc   :  { %v142_v39 = vsel %vm59_vm8, %v141_v37, %v140_v36 }
  0xcd   :  { %v145_v40 = vsel %vm58_vm9, %v451_v23, %v142_v39 }
  0xce   :  { %348 = vcosq.f32 %v145_v40 }
  0xcf   :  { %350 = vsinq.f32 %v145_v40 }
  0xdb   :  { %v349_v45 = vpop.eup %348 }
  0xdc   :  { %v351_v46 = vpop.eup %350  ;;  %v157_v47 = vxor.u32 2147483648, %v349_v45 }
  0xdd   :  { %v154_v48 = vxor.u32 2147483648, %v351_v46 }
  0xde   :  { %v158_v49 = vsel %vm156_vm10, %v157_v47, %v351_v46 }
  0xdf   :  { %v155_v50 = vsel %vm153_vm11, %v349_v45, %v154_v48 }
  0xe0   :  { %v159_v25 = vsel %vm152_vm12, %v155_v50, %v158_v49 }
  0xe1   :  { %v160_v51 = vsel %vm149_vm13, nan, %v159_v25 }
  0xe2   :  { %328 = vmatmul.mubr.f32.vlgmr.msra.gmra.mxu0 %v160_v51 }
 0x1a2   :  { %v250_v53 = vpop.f32.mrf.mxu0 }
 0x1a3   :  { %v251_v54 = vadd.f32 %v277_v52, %v250_v53 }
 0x1a4   :  { %v329_v55 = vpop.f32.mrf.mxu0 }
 0x1a5   :  { %v254_v56 = vmax.f32 %v251_v54, 0.0 }
 0x1a7   :  { %255 = vst [vmem:[#allocation5] sm:$0xff] %v254_v56 }
 0x1a8   :  { %383 = shalt.err (!%p380_p9)
}
 0x1a9   :  { %265 = dma.vmem_to_hbm [thread:$0]  %s263_s30, 128, %s483_s5, [#allocation4]  }
 0x1aa   :  { %394 = dma.done.wait [#allocation4], 128  }
 0x1ab   :  { %395 = vsyncadd [#allocation4], 4294967168 }
 0x1ac   :  { %269 = vsyncpa [#allocation3], 1 }
 0x1ad   :  { %270 = vsyncpa [#allocation4], 1 }

</bundles_post_ra>
